<compile_context>
chip_gen: v7x
topology: tpu7x:2x2x1
jax: 0.10.0
libtpu: 0.0.40
codegen_flags: <defaults>
</compile_context>

<pallas_src>
import jax
import jax.numpy as jnp
from jax.experimental import pallas as pl
from jax.experimental.pallas import tpu as pltpu


def _meanshift_kernel(b_ref, x_ref, o_ref):
    # b_ref: (R, 1)   per-row bias (sign * mean_rgb, tiled over batch / fold)
    # x_ref: (R, TL)  lane tile of the (R, lanes) slab
    # o_ref: (R, TL)  output tile
    o_ref[...] = (x_ref[...] + b_ref[...]).astype(o_ref.dtype)


def _device_budgets():
    """Per-generation (block_budget_bytes, vmem_limit_bytes, two_cores)."""
    kind = ""
    try:
        kind = jax.devices()[0].device_kind.lower()
    except Exception:
        pass
    if ("v7" in kind) or ("7x" in kind):
        # v7x: 64 MiB VMEM/TC; 2 bufs x (in + out) ~= 4x block must fit.
        return 10 * 1024 * 1024, 48 * 1024 * 1024, True
    if ("v6" in kind) or ("v5" in kind):
        # v5e/v6e: 128 MiB physical VMEM; raise the small default scoped limit.
        return 20 * 1024 * 1024, 96 * 1024 * 1024, False
    # Unknown chip: conservative values that fit every generation.
    return 8 * 1024 * 1024, 48 * 1024 * 1024, False


def _pick_row_fold(rows, hw):
    """Smallest k so rows*k is a multiple of 8 (dense sublanes), k divides
    H*W exactly (zero-copy reshape), and the lane extent stays >= 128."""
    for k in (1, 2, 4, 8):
        if (rows * k) % 8 == 0 and hw % k == 0 and hw // k >= 128:
            return k
    return 1


def _pick_lane_tile(lanes, rows, itemsize, block_budget_bytes, two_cores):
    """Largest 128-multiple lane tile within the per-block VMEM budget, with a
    ragged (pl.cdiv) grid.  On 2-TC chips keep >= 2 blocks and prefer an even
    count so megacore sharding is balanced."""
    rnd128 = lambda v: ((v + 127) // 128) * 128
    if lanes <= 128:
        return lanes, 1  # full-extent lane block, single grid step
    budget_lanes = max(
        128, (block_budget_bytes // max(rows * itemsize, 1)) // 128 * 128
    )
    tile = min(budget_lanes, rnd128(lanes))
    grid = pl.cdiv(lanes, tile)
    if two_cores:
        if grid == 1:
            tile = max(128, rnd128(pl.cdiv(lanes, 2)))
            grid = pl.cdiv(lanes, tile)
        elif grid % 2 == 1:
            t2 = max(128, rnd128(pl.cdiv(lanes, grid + 1)))
            g2 = pl.cdiv(lanes, t2)
            if g2 % 2 == 0:
                tile, grid = t2, g2
    return tile, grid


def mean_shift(x, mean_rgb, sub):
    """MeanShift forward for NCHW input x (C must be 3)."""
    sign = -1.0 if sub else 1.0
    n, c, h, w = x.shape
    assert c == 3, "MeanShift expects 3 input channels"
    rows, hw = n * c, h * w

    block_budget, vmem_limit, two_cores = _device_budgets()
    itemsize = jnp.dtype(x.dtype).itemsize

    # Optional fold of the row axis to make sublanes dense (multiple of 8).
    k = _pick_row_fold(rows, hw)
    rows_t, lanes = rows * k, hw // k

    # Bias in the input dtype (one value per folded row).
    bias_dtype = x.dtype if jnp.issubdtype(x.dtype, jnp.floating) else jnp.float32
    bias_c = sign * jnp.asarray(mean_rgb, dtype=bias_dtype)            # (3,)
    bias = jnp.repeat(jnp.tile(bias_c, n), k).reshape(rows_t, 1)       # (rows_t, 1)

    # NCHW -> (rows_t, lanes): contiguous, zero-copy reshape.
    x2 = x.reshape(rows_t, lanes)

    tile_l, grid_l = _pick_lane_tile(lanes, rows_t, itemsize, block_budget, two_cores)

    out2 = pl.pallas_call(
        _meanshift_kernel,
        out_shape=jax.ShapeDtypeStruct((rows_t, lanes), x.dtype),
        grid=(grid_l,),
        in_specs=[
            pl.BlockSpec((rows_t, 1), lambda i: (0, 0)),        # bias: tiny, resident
            pl.BlockSpec((rows_t, tile_l), lambda i: (0, i)),   # input lane tile
        ],
        out_specs=pl.BlockSpec((rows_t, tile_l), lambda i: (0, i)),
        compiler_params=pltpu.CompilerParams(
            dimension_semantics=("parallel",),
            vmem_limit_bytes=vmem_limit,
        ),
    )(bias, x2)

    return out2.reshape(n, c, h, w)  # free reshape back to NCHW


if __name__ == "__main__":
    key = jax.random.PRNGKey(0)
    # Small NCHW input consistent with the module: batch=2, channels=3, 16x16.
    x = jax.random.normal(key, (2, 3, 16, 16), dtype=jnp.float32)

    mean_rgb = (0.4488, 0.4371, 0.4040)  # typical DIV2K RGB mean
    sub = True

    out = mean_shift(x, mean_rgb, sub)
    out = jax.block_until_ready(out)

    # Reference: identity-weight 1x1 conv == x + sign*mean per channel.
    sign = -1.0 if sub else 1.0
    ref = x + sign * jnp.asarray(mean_rgb, dtype=jnp.float32).reshape(1, 3, 1, 1)
    assert out.shape == x.shape and out.dtype == x.dtype
    assert jnp.allclose(out, ref, atol=1e-5, rtol=1e-5)

    print("KERNEL_OK")
</pallas_src>

<mosaic_0001>
module attributes {stable_mosaic.version = 11 : i64} {
  func.func @_meanshift_kernel(%arg0: i32, %arg1: memref<6x1xf32, #tpu.memory_space<vmem>>, %arg2: memref<6x256xf32, #tpu.memory_space<vmem>>, %arg3: memref<6x256xf32, #tpu.memory_space<vmem>>) attributes {dimension_semantics = [#tpu.dimension_semantics<parallel>], iteration_bounds = array<i64: 1>, scalar_prefetch = 0 : i64, scratch_operands = 0 : i64, tpu.core_type = #tpu.core_type<tc>, window_params = [{pipeline_mode = #tpu.pipeline_mode<synchronous>, transform_indices = @transform_0, window_bounds = array<i64: 6, 1>}, {transform_indices = @transform_1, window_bounds = array<i64: 6, 256>}, {transform_indices = @transform_2, window_bounds = array<i64: 6, 256>}]} {
    %c0 = arith.constant 0 : index
    %c0_0 = arith.constant 0 : index
    %0 = vector.load %arg2[%c0, %c0_0] : memref<6x256xf32, #tpu.memory_space<vmem>>, vector<6x256xf32>
    %c0_1 = arith.constant 0 : index
    %c0_2 = arith.constant 0 : index
    %1 = vector.load %arg1[%c0_1, %c0_2] : memref<6x1xf32, #tpu.memory_space<vmem>>, vector<6x1xf32>
    %2 = vector.broadcast %1 : vector<6x1xf32> to vector<6x256xf32>
    %3 = arith.addf %0, %2 : vector<6x256xf32>
    %c0_3 = arith.constant 0 : index
    %c0_4 = arith.constant 0 : index
    %4 = vector.load %arg3[%c0_3, %c0_4] : memref<6x256xf32, #tpu.memory_space<vmem>>, vector<6x256xf32>
    tpu.vector_store %arg3[%c0_3, %c0_4], %3 {strides = array<i32>} : memref<6x256xf32, #tpu.memory_space<vmem>>, vector<6x256xf32>,
    return
  }
  func.func @transform_0(%arg0: i32) -> (i32, i32) {
    %c0_i32 = arith.constant 0 : i32
    %c0_i32_0 = arith.constant 0 : i32
    %c0_i32_1 = arith.constant 0 : i32
    return %c0_i32, %c0_i32_0 : i32, i32
  }
  func.func @transform_1(%arg0: i32) -> (i32, i32) {
    %c0_i32 = arith.constant 0 : i32
    %c0_i32_0 = arith.constant 0 : i32
    return %c0_i32, %arg0 : i32, i32
  }
  func.func @transform_2(%arg0: i32) -> (i32, i32) {
    %c0_i32 = arith.constant 0 : i32
    %c0_i32_0 = arith.constant 0 : i32
    return %c0_i32, %arg0 : i32, i32
  }
}

</mosaic_0001>

<bundles_post_ra>
// kernel: tpu_custom_call.1
= control target key start
LH: loop header
LB: loop body
LE: loop exit
PB: predicated region body
PF: predicated region fallthrough
CT: control target
= control target key end

     0   :  { %7 = vsyncpa [#allocation3], 0  ;;  %s148_s0 = inlined_call_operand.vmem [shape: f32[6,1], index: 0, kind: input, shape index: {}]   ;;  %s149_s1 = inlined_call_operand.hbm [shape: f32[6,256], index: 1, kind: input, shape index: {}]   ;;  %s150_s2 = inlined_call_operand.hbm [shape: f32[6,256], index: 2, kind: output, shape index: {}]  }
   0x1   :  { %8 = vsyncpa [#allocation4], 0  ;;  %s103_s9 = smov [#allocation2]   ;;  %s55_s13 = scalar_lea.hbm %s149_s1, 256 }
   0x2   :  { %s17_s10 = sshll.u32 %s103_s9, 4  ;;  %p56_p0 = scmp.ne.s32.totalorder %s149_s1, %s55_s13  ;;  %s18_s10 = int_to_ptr.vmem [resolvable:$true] %s17_s10 }
   0x3   :  { %p59_p1 = scmp.lt.u32.totalorder %s55_s13, %s149_s1 }
   0x5   :  { %p61_p2 = pnand %p59_p1, %p56_p0 }
   0x7   :  { %64 = shalt.err (!%p61_p2)
}
   0x8   :  { %s65_s18 = scalar_lea.vmem %s18_s10, 256  ;;  %p70_p4 = scmp.lt.s32.totalorder %s18_s10, %s18_s10 }
   0x9   :  { %p66_p3 = scmp.ne.s32.totalorder %s18_s10, %s65_s18  ;;  %p71_p5 = scmp.lt.s32.totalorder %s65_s18, %s65_s18 }
   0xb   :  { %p72_p6 = por %p71_p5, %p70_p4 }
   0xd   :  { %p73_p7 = pnand %p72_p6, %p66_p3 }
   0xf   :  { %76 = shalt.err (!%p73_p7)
}
  0x10   :  { %20 = dma.hbm_to_vmem [thread:$0]  %s149_s1, 256, %s18_s10, [#allocation3]  }
  0x11   :  { %99 = dma.done.wait [#allocation3], 256  }
  0x12   :  { %100 = vsyncadd [#allocation3], 4294967040  ;;  %v104_v0 = vmov 0   ;;  %v26_v1 = vld [vmem:[%s148_s0] sm:$0x3f]  ;;  %s105_s23 = smov [#allocation5]  }
  0x13   :  { %54 = vset.pattern.permute.xlu0 %v104_v0  ;;  %v24_v2 = vld [vmem:[#allocation2] sm:$0x3f]  ;;  %v25_v3 = vld [vmem:[#allocation2 + $0x8] sm:$0x3f]  ;;  %s42_s24 = sshll.u32 %s105_s23, 4  ;;  %s43_s24 = int_to_ptr.vmem [resolvable:$true] %s42_s24 }
  0x14   :  { %29 = vperm.xlu0 %54, %v26_v1   ;;  %s77_s1 = scalar_lea.vmem %s43_s24, 256  ;;  %p82_p9 = scmp.lt.s32.totalorder %s43_s24, %s43_s24 }
  0x15   :  { %p78_p8 = scmp.ne.s32.totalorder %s43_s24, %s77_s1  ;;  %p83_p10 = scmp.lt.s32.totalorder %s77_s1, %s77_s1 }
  0x17   :  { %p84_p11 = por %p83_p10, %p82_p9 }
  0x19   :  { %p85_p12 = pnand %p84_p11, %p78_p8 }
  0x93   :  { %v30_v4 = vpop.permute.xlu0 %29 }
  0x94   :  { %v32_v5 = vadd.f32 %v30_v4, %v24_v2  ;;  %v33_v6 = vadd.f32 %v30_v4, %v25_v3 }
  0x96   :  { %34 = vst [vmem:[#allocation5] sm:$0x3f] %v32_v5  ;;  %35 = vst [vmem:[#allocation5 + $0x8] sm:$0x3f] %v33_v6 }
  0x97   :  { %88 = shalt.err (!%p85_p12)
}
  0x98   :  { %s89_s26 = scalar_lea.hbm %s150_s2, 256 }
  0x99   :  { %p90_p13 = scmp.ne.s32.totalorder %s150_s2, %s89_s26  ;;  %p93_p0 = scmp.lt.u32.totalorder %s89_s26, %s150_s2 }
  0x9b   :  { %p95_p1 = pnand %p93_p0, %p90_p13 }
  0x9d   :  { %98 = shalt.err (!%p95_p1)
}
  0x9e   :  { %45 = dma.vmem_to_hbm [thread:$0]  %s43_s24, 256, %s150_s2, [#allocation4]  }
  0x9f   :  { %101 = dma.done.wait [#allocation4], 256  }
  0xa0   :  { %102 = vsyncadd [#allocation4], 4294967040 }
  0xa1   :  { %49 = vsyncpa [#allocation3], 1 }
  0xa2   :  { %50 = vsyncpa [#allocation4], 1 }

</bundles_post_ra>
